<compile_context>
chip_gen: v5e
topology: v5e:2x2
jax: 0.10.0
libtpu: 0.0.40
codegen_flags: <defaults>
</compile_context>

<pallas_src>
import functools

import jax
import jax.numpy as jnp
from jax.experimental import pallas as pl
from jax.experimental.pallas import tpu as pltpu


def _round_up(v, m):
    return ((v + m - 1) // m) * m


def _auto_tm(n):
    # >= 2 row-stripes whenever possible (v7x megacore), bigger stripes for big N.
    if n <= 128:
        return n
    if n <= 1024:
        return 128
    if n <= 4096:
        return 256
    return 512


# -----------------------------------------------------------------------------
# Fused GCN kernel: one grid step computes  o_stripe = relu(adj_stripe @ (x @ W))
# -----------------------------------------------------------------------------
def _fused_gcn_kernel(adj_ref, x_ref, w_ref, o_ref, *, compute_dtype):
    # h = x @ W, recomputed per adj row-stripe (megacore-safe, no scratch state).
    h = jnp.dot(x_ref[...], w_ref[...], preferred_element_type=jnp.float32)
    h = h.astype(compute_dtype)
    acc = jnp.dot(adj_ref[...], h, preferred_element_type=jnp.float32)
    o_ref[...] = jnp.maximum(acc, 0.0).astype(o_ref.dtype)


def _fused_gcn(adj, x, w, *, tm, out_dtype, compute_dtype, vmem_limit):
    n_pad, f_in = x.shape
    f_out = w.shape[1]
    return pl.pallas_call(
        functools.partial(_fused_gcn_kernel, compute_dtype=compute_dtype),
        out_shape=jax.ShapeDtypeStruct((n_pad, f_out), out_dtype),
        grid_spec=pltpu.PrefetchScalarGridSpec(
            num_scalar_prefetch=0,
            grid=(n_pad // tm,),
            in_specs=[
                # adj row-stripe streamed over the grid.
                # (If DMA waits show exposed on v5e, add pipeline_mode=pl.Buffered(3).)
                pl.BlockSpec((tm, n_pad), lambda i: (i, 0)),
                # x and W: constant block index -> resident in VMEM across the grid.
                pl.BlockSpec((n_pad, f_in), lambda i: (0, 0)),
                pl.BlockSpec((f_in, f_out), lambda i: (0, 0)),
            ],
            out_specs=pl.BlockSpec((tm, f_out), lambda i: (i, 0)),
        ),
        compiler_params=pltpu.CompilerParams(
            dimension_semantics=("parallel",),
            vmem_limit_bytes=vmem_limit,
        ),
    )(adj, x, w)


# -----------------------------------------------------------------------------
# General tiled matmul fallback (used when the fused path would overflow VMEM).
# -----------------------------------------------------------------------------
def _matmul_kernel_single_k(a_ref, b_ref, o_ref, *, apply_relu):
    acc = jnp.dot(a_ref[...], b_ref[...], preferred_element_type=jnp.float32)
    if apply_relu:
        acc = jnp.maximum(acc, 0.0)
    o_ref[...] = acc.astype(o_ref.dtype)


def _matmul_kernel_k_loop(a_ref, b_ref, o_ref, acc_ref, *, apply_relu):
    @pl.when(pl.program_id(2) == 0)
    def _():
        acc_ref[...] = jnp.zeros_like(acc_ref)

    acc_ref[...] += jnp.dot(a_ref[...], b_ref[...],
                            preferred_element_type=jnp.float32)

    @pl.when(pl.program_id(2) == pl.num_programs(2) - 1)
    def _():
        res = acc_ref[...]
        if apply_relu:
            res = jnp.maximum(res, 0.0)
        o_ref[...] = res.astype(o_ref.dtype)


def pallas_matmul(a, b, *, apply_relu=False, out_dtype=None,
                  tm=256, tn=256, tk=512):
    m, k = a.shape
    k2, n = b.shape
    assert k == k2
    out_dtype = out_dtype or a.dtype

    tm = min(tm, _round_up(m, 8))
    tn = min(tn, _round_up(n, 128))
    tk = min(tk, _round_up(k, 128))
    mp, kp, np_ = _round_up(m, tm), _round_up(k, tk), _round_up(n, tn)
    if (mp, kp) != (m, k):
        a = jnp.pad(a, ((0, mp - m), (0, kp - k)))
    if (kp, np_) != (k, n):
        b = jnp.pad(b, ((0, kp - k), (0, np_ - n)))

    if kp == tk:
        # K fits a single tile: no reduction axis, no accumulator scratch.
        out = pl.pallas_call(
            functools.partial(_matmul_kernel_single_k, apply_relu=apply_relu),
            out_shape=jax.ShapeDtypeStruct((mp, np_), out_dtype),
            grid_spec=pltpu.PrefetchScalarGridSpec(
                num_scalar_prefetch=0,
                grid=(mp // tm, np_ // tn),
                in_specs=[
                    pl.BlockSpec((tm, tk), lambda i, j: (i, 0)),
                    pl.BlockSpec((tk, tn), lambda i, j: (0, j)),
                ],
                out_specs=pl.BlockSpec((tm, tn), lambda i, j: (i, j)),
            ),
            compiler_params=pltpu.CompilerParams(
                dimension_semantics=("parallel", "parallel")),
        )(a, b)
    else:
        out = pl.pallas_call(
            functools.partial(_matmul_kernel_k_loop, apply_relu=apply_relu),
            out_shape=jax.ShapeDtypeStruct((mp, np_), out_dtype),
            grid_spec=pltpu.PrefetchScalarGridSpec(
                num_scalar_prefetch=0,
                grid=(mp // tm, np_ // tn, kp // tk),
                in_specs=[
                    pl.BlockSpec((tm, tk), lambda i, j, kk: (i, kk)),
                    pl.BlockSpec((tk, tn), lambda i, j, kk: (kk, j)),
                ],
                out_specs=pl.BlockSpec((tm, tn), lambda i, j, kk: (i, j)),
                scratch_shapes=[pltpu.VMEM((tm, tn), jnp.float32)],
            ),
            compiler_params=pltpu.CompilerParams(
                dimension_semantics=("parallel", "parallel", "arbitrary")),
        )(a, b)

    if (mp, np_) != (m, n):
        out = out[:m, :n]
    return out


# -----------------------------------------------------------------------------
# Public wrapper: GraphConvSparse.forward(inputs=x, adj=adj) with activation=relu
# -----------------------------------------------------------------------------
def graph_conv_sparse(x, adj, weight, *, compute_dtype=jnp.bfloat16,
                      out_dtype=None, tm=None, fused_vmem_budget=40 * 2**20):
    n, f_in = x.shape
    f_out = weight.shape[1]
    assert adj.shape == (n, n) and weight.shape[0] == f_in
    out_dtype = out_dtype or x.dtype

    xc = x.astype(compute_dtype)
    ac = adj.astype(compute_dtype)
    wc = weight.astype(compute_dtype)

    tm_ = tm or _auto_tm(n)
    n_pad = _round_up(n, tm_)
    bpe = jnp.dtype(compute_dtype).itemsize
    # Rough VMEM footprint of the fused kernel (double-buffered adj/out tiles,
    # resident x/W, f32 temporary for h). Conservative budget keeps v7x (64 MiB
    # physical per TC) comfortable.
    est = (2 * tm_ * n_pad * bpe                                   # adj stripe
           + 2 * n_pad * f_in * bpe                                # x
           + 2 * f_in * f_out * bpe                                # W
           + n_pad * f_out * 4                                     # h (f32)
           + 2 * tm_ * f_out * jnp.dtype(out_dtype).itemsize)      # out tile

    if est <= fused_vmem_budget:
        if n_pad != n:
            ac = jnp.pad(ac, ((0, n_pad - n), (0, n_pad - n)))
            xc = jnp.pad(xc, ((0, n_pad - n), (0, 0)))
        vmem_limit = int(min(56 * 2**20, max(32 * 2**20, 2 * est)))
        out = _fused_gcn(ac, xc, wc, tm=tm_, out_dtype=out_dtype,
                         compute_dtype=compute_dtype, vmem_limit=vmem_limit)
        return out[:n] if n_pad != n else out

    # Fallback for very large graphs: two calls (h round-trips HBM), still with
    # fused ReLU and no k-loop when the contraction dim fits one tile.
    h = pallas_matmul(xc, wc, apply_relu=False, out_dtype=compute_dtype)
    return pallas_matmul(ac, h, apply_relu=True, out_dtype=out_dtype)


def random_uniform_init(key, input_dim, output_dim):
    # Glorot-style uniform init, matching random_uniform_init in GAE-style repos.
    init_range = jnp.sqrt(6.0 / (input_dim + output_dim))
    return jax.random.uniform(
        key, (input_dim, output_dim), dtype=jnp.float32,
        minval=-init_range, maxval=init_range,
    )


if __name__ == "__main__":
    key = jax.random.PRNGKey(0)
    k_x, k_adj, k_w = jax.random.split(key, 3)

    # Small shapes consistent with the module: N nodes, input_dim -> output_dim.
    N, input_dim, output_dim = 256, 128, 128

    x = jax.random.normal(k_x, (N, input_dim), dtype=jnp.float32)

    # Symmetric, row-normalized dense adjacency (deterministic).
    a = (jax.random.uniform(k_adj, (N, N)) > 0.9).astype(jnp.float32)
    adj = a + a.T + jnp.eye(N, dtype=jnp.float32)
    adj = adj / jnp.sum(adj, axis=1, keepdims=True)

    weight = random_uniform_init(k_w, input_dim, output_dim)

    # Pure-JAX reference.
    ref = jnp.maximum(adj @ (x @ weight), 0.0)

    # 1) Fused kernel, f32 compute (exact path).
    out_f32 = graph_conv_sparse(x, adj, weight, compute_dtype=jnp.float32)
    out_f32 = jax.block_until_ready(out_f32)
    assert out_f32.shape == (N, output_dim)
    assert jnp.allclose(out_f32, ref, atol=1e-4, rtol=1e-4)

    # 2) Fused kernel, default bf16 compute (fast MXU path).
    out_bf16 = graph_conv_sparse(x, adj, weight)
    out_bf16 = jax.block_until_ready(out_bf16)
    assert out_bf16.shape == (N, output_dim)
    assert jnp.allclose(out_bf16, ref, atol=5e-2, rtol=5e-2)

    # 3) Force the two-call fallback route (single-k-tile matmul kernels).
    out_fb = graph_conv_sparse(x, adj, weight, compute_dtype=jnp.float32,
                               fused_vmem_budget=0)
    out_fb = jax.block_until_ready(out_fb)
    assert jnp.allclose(out_fb, ref, atol=1e-4, rtol=1e-4)

    # 4) Exercise the k-looped fallback matmul kernel as well.
    h_ref = x @ weight
    out_k = pallas_matmul(adj, h_ref, apply_relu=True, tm=128, tn=128, tk=128)
    out_k = jax.block_until_ready(out_k)
    assert jnp.allclose(out_k, ref, atol=1e-4, rtol=1e-4)

    print("KERNEL_OK")
</pallas_src>

<mosaic_0001>
module attributes {stable_mosaic.version = 11 : i64} {
  func.func @_fused_gcn_kernel(%arg0: i32, %arg1: memref<128x256xf32, #tpu.memory_space<vmem>>, %arg2: memref<256x128xf32, #tpu.memory_space<vmem>>, %arg3: memref<128x128xf32, #tpu.memory_space<vmem>>, %arg4: memref<128x128xf32, #tpu.memory_space<vmem>>) attributes {dimension_semantics = [#tpu.dimension_semantics<parallel>], iteration_bounds = array<i64: 2>, scalar_prefetch = 0 : i64, scratch_operands = 0 : i64, tpu.core_type = #tpu.core_type<tc>, window_params = [{transform_indices = @transform_0, window_bounds = array<i64: 128, 256>}, {pipeline_mode = #tpu.pipeline_mode<synchronous>, transform_indices = @transform_1, window_bounds = array<i64: 256, 128>}, {pipeline_mode = #tpu.pipeline_mode<synchronous>, transform_indices = @transform_2, window_bounds = array<i64: 128, 128>}, {transform_indices = @transform_3, window_bounds = array<i64: 128, 128>}]} {
    %c0 = arith.constant 0 : index
    %c0_0 = arith.constant 0 : index
    %0 = vector.load %arg2[%c0, %c0_0] : memref<256x128xf32, #tpu.memory_space<vmem>>, vector<256x128xf32>
    %c0_1 = arith.constant 0 : index
    %c0_2 = arith.constant 0 : index
    %1 = vector.load %arg3[%c0_1, %c0_2] : memref<128x128xf32, #tpu.memory_space<vmem>>, vector<128x128xf32>
    %cst = arith.constant dense<0.000000e+00> : vector<256x128xf32>
    %2 = tpu.matmul %0, %1, %cst {dimension_numbers = #tpu.dot_dimension_numbers<[1], [0], [0], [1], [0, 0, 1, 1], [], []>} : vector<256x128xf32>, vector<128x128xf32>, vector<256x128xf32> -> vector<256x128xf32>
    %c0_3 = arith.constant 0 : index
    %c0_4 = arith.constant 0 : index
    %3 = vector.load %arg1[%c0_3, %c0_4] : memref<128x256xf32, #tpu.memory_space<vmem>>, vector<128x256xf32>
    %cst_5 = arith.constant dense<0.000000e+00> : vector<128x128xf32>
    %4 = tpu.matmul %3, %2, %cst_5 {dimension_numbers = #tpu.dot_dimension_numbers<[1], [0], [0], [1], [0, 0, 1, 1], [], []>} : vector<128x256xf32>, vector<256x128xf32>, vector<128x128xf32> -> vector<128x128xf32>
    %cst_6 = arith.constant 0.000000e+00 : f32
    %5 = vector.broadcast %cst_6 : f32 to vector<128x128xf32>
    %6 = arith.maximumf %4, %5 : vector<128x128xf32>
    %c0_7 = arith.constant 0 : index
    %c0_8 = arith.constant 0 : index
    %7 = vector.load %arg4[%c0_7, %c0_8] : memref<128x128xf32, #tpu.memory_space<vmem>>, vector<128x128xf32>
    tpu.vector_store %arg4[%c0_7, %c0_8], %6 {strides = array<i32>} : memref<128x128xf32, #tpu.memory_space<vmem>>, vector<128x128xf32>,
    return
  }
  func.func @transform_0(%arg0: i32) -> (i32, i32) {
    %c0_i32 = arith.constant 0 : i32
    %c0_i32_0 = arith.constant 0 : i32
    return %arg0, %c0_i32 : i32, i32
  }
  func.func @transform_1(%arg0: i32) -> (i32, i32) {
    %c0_i32 = arith.constant 0 : i32
    %c0_i32_0 = arith.constant 0 : i32
    %c0_i32_1 = arith.constant 0 : i32
    return %c0_i32, %c0_i32_0 : i32, i32
  }
  func.func @transform_2(%arg0: i32) -> (i32, i32) {
    %c0_i32 = arith.constant 0 : i32
    %c0_i32_0 = arith.constant 0 : i32
    %c0_i32_1 = arith.constant 0 : i32
    return %c0_i32, %c0_i32_0 : i32, i32
  }
  func.func @transform_3(%arg0: i32) -> (i32, i32) {
    %c0_i32 = arith.constant 0 : i32
    %c0_i32_0 = arith.constant 0 : i32
    return %arg0, %c0_i32 : i32, i32
  }
}

</mosaic_0001>

<bundles_post_ra>
// kernel: tpu_custom_call.1
= control target key start
LH: loop header
LB: loop body
LE: loop exit
PB: predicated region body
PF: predicated region fallthrough
CT: control target
= control target key end

     0   :  { %8 = vsyncpa [#allocation3], 0  ;;  %s1189_s0 = inlined_call_operand.hbm [shape: f32[256,256], index: 0, kind: input, shape index: {}]   ;;  %s1190_s1 = inlined_call_operand.hbm [shape: f32[256,128], index: 1, kind: input, shape index: {}]   ;;  %s1191_s2 = inlined_call_operand.hbm [shape: f32[128,128], index: 2, kind: input, shape index: {}]   ;;  %s1192_s3 = inlined_call_operand.hbm [shape: f32[256,128], index: 3, kind: output, shape index: {}]  }
   0x1   :  { %10 = vsyncpa [#allocation3 + $0x1], 0 }
   0x2   :  { %11 = vsyncpa [#allocation6], 0 }
   0x3   :  { %12 = vsyncpa [#allocation4], 0 }
   0x4   :  { %14 = vsyncpa [#allocation4 + $0x1], 0  ;;  %s991_s12 = smov 0   ;;  %s993_s13 = smov 0  }
   0x5   :  { %s995_s14 = smov 0   ;;  %s997_s15 = smov 0  }
   0x6 LB: > { %s1012_s16 = sadd.s32 4294967295, %s961_s15   ;;  %s690_s17 = sadd.s32 4294967294, %s961_s15   ;;  %s961_s15 = sphi %s997_s15, %s1202_s15   ;;  %s957_s14 = sphi %s995_s14, %s1201_s14   ;;  %s953_s13 = sphi %s993_s13, %s1200_s13   ;;  %s949_s12 = sphi %s991_s12, %s1199_s12  }
   0x7   : > { %p40_p0 = scmp.ne.s32.totalorder %s953_s13, %s949_s12  ;;  %p41_p1 = scmp.eq.s32.totalorder %s1012_s16, 0 }
   0x8   : > { %p106_p2 = scmp.eq.s32.totalorder %s1012_s16, 1  ;;  %p112_p3 = scmp.eq.s32.totalorder %s690_s17, 1 }
   0x9   : > { %p1021_p4 = por %p41_p1, %p40_p0  ;;  %p691_p5 = scmp.ge.s32.totalorder %s961_s15, 1 }
   0xa   : > { %p1026_p6 = por %p112_p3, %p40_p0  ;;  %p119_p7 = scmp.lt.s32.totalorder %s961_s15, 3 }
   0xb   : > { %s130_s22 = sshll.u32 %s1190_s1, 4  ;;  %s963_s24 = smov [#allocation5]   ;;  %s131_s22 = int_to_ptr.hbm [resolvable:$true] %s130_s22 }
   0xc   : > { %p1034_p8 = pnand %p691_p5, %p119_p7  ;;  %s132_s25 = sshll.u32 %s963_s24, 4  ;;  %s133_s25 = int_to_ptr.vmem [resolvable:$true] %s132_s25 }
   0xd   : > { %s144_s28 = sshll.u32 %s1191_s2, 4  ;;  %s964_s29 = smov 128   ;;  %s145_s28 = int_to_ptr.hbm [resolvable:$true] %s144_s28 }
   0xe   : > { %p740_p9 = pneg %p1034_p8  ;;  %s965_s30 = smov 8  }
   0xf   : > { %s966_s4 = smov [#allocation7]   ;;  %s1047_s6 = sadd.s32 1, %s961_s15  }
  0x10   : > { %p741_p10 = pnand %p740_p9, %p41_p1  ;;  %s146_s5 = sshll.u32 %s966_s4, 4  ;;  %s147_s5 = int_to_ptr.vmem [resolvable:$true] %s146_s5 }
  0x11   : > { %s27_s7 = sadd.s32 1, %s957_s14  ;;  %s24_s8 = ssub.s32 %s961_s15, %s1047_s6 }
  0x12   : > { %743 = dma.hbm_to_vmem [thread:$0]  (!%p741_p10), %s131_s22, 4096, %s133_s25, [#allocation6], %s964_s29, %s964_s29, %s965_s30  }
  0x13   : > { %746 = dma.hbm_to_vmem [thread:$0]  (!%p741_p10), %s145_s28, 2048, %s147_s5, [#allocation6], %s964_s29, %s964_s29, %s965_s30  }
  0x14   : > { %p34_p12 = scmp.ne.s32.totalorder %s957_s14, %s953_s13  ;;  %p25_p13 = scmp.eq.s32.totalorder %s24_s8, 0 }
  0x15   : > { %p35_p0 = scmp.eq.s32.totalorder %s961_s15, 0  ;;  %p757_p5 = scmp.lt.s32.totalorder %s961_s15, 2 }
  0x16   : > { %p1057_p3 = por %p106_p2, %p34_p12  ;;  %s160_s11 = sand.u32 1, %s957_s14  }
  0x17   : > { %s1063_s10 = scalar_select %p25_p13, %s957_s14, %s27_s7  }
  0x18   : > { %p36_p7 = por %p35_p0, %p34_p12  ;;  %s695_s17 = sshll.u32 %s160_s11, 8 }
  0x19   : > { %s710_s20 = sshll.u32 %s961_s15, 8  ;;  %s164_s25 = scalar_lea.vmem [#allocation2], %s695_s17 }
  0x1a   : > { %s170_s24 = scalar_lea.hbm %s1189_s0, %s710_s20  ;;  %s173_s26 = sshll.u32 %s164_s25, 4  ;;  %s174_s26 = int_to_ptr.vmem [resolvable:$true] %s173_s26 }
  0x1b   : > { %s171_s27 = sshll.u32 %s170_s24, 4  ;;  %p1070_p2 = pnand %p757_p5, %p36_p7  ;;  %s172_s27 = int_to_ptr.hbm [resolvable:$true] %s171_s27 }
  0x1c   : > { %s161_s29 = scalar_lea.sflag [#allocation3], %s160_s11  ;;  %s861_s30 = sshra.s32 %s172_s27, 4  ;;  %s862_s30 = int_to_ptr.hbm [resolvable:$true] %s861_s30 }
  0x1d   : > { %s863_s4 = scalar_lea.hbm %s862_s30, 256  ;;  %p865_p10 = pneg %p1070_p2 }
  0x1e   : > { %p864_p9 = scmp.ne.s32.totalorder %s862_s30, %s863_s4  ;;  %s868_s8 = scalar_lea.hbm %s1189_s0, 512 }
  0x1f   : > { %p869_p0 = scmp.lt.s32.totalorder %s862_s30, %s1189_s0  ;;  %p870_p5 = scmp.lt.s32.totalorder %s868_s8, %s863_s4 }
  0x20   : > { %p866_p12 = pnand %p865_p10, %p864_p9 }
  0x21   : > { %p871_p7 = por %p870_p5, %p869_p0 }
  0x22   : > { %p867_p13 = pneg %p866_p12 }
  0x24   : > { %p872_p11 = pnand %p871_p7, %p867_p13 }
  0x26   : > { %875 = shalt.err (!%p872_p11)
}
  0x27   : > { %s967_s11 = smov 256   ;;  %s968_s21 = smov 16  }
  0x28   : > { %750 = dma.hbm_to_vmem [thread:$0]  (!%p1070_p2), %s172_s27, 4096, %s174_s26, %s161_s29, %s967_s11, %s967_s11, %s968_s21  }
  0x29   : > { %185 = sbr.rel (%p1034_p8) target bundleno = 624 (0x270), region = 32  ;;  %s1087_s22 = sand.u32 (!%p1034_p8), 1, %s953_s13  }
  0x2a   : > { %s700_s24 = sshll.u32 (!%p1034_p8), %s1087_s22, 8  ;;  %s188_s25 = scalar_lea.sflag (!%p1034_p8), [#allocation3], %s1087_s22 }
  0x2b   : > { %s1091_s30 = scalar_lea.vmem (!%p1034_p8), [#allocation2], %s700_s24 }
  0x2e   : > { %936 = dma.done.wait (%p1021_p4), %s188_s25, 4096  }
  0x2f   : > { %938 = vsyncadd (%p1021_p4), %s188_s25, 4294963200 }
  0x30   : > { %940 = dma.done.wait (%p41_p1), [#allocation6], 6144  }
  0x31   : > { %942 = vsyncadd (%p41_p1), [#allocation6], 4294961152  ;;  %v274_v0 = vld [vmem:[#allocation7 + $0x78] sm:$0xff]  ;;  %v273_v1 = vld [vmem:[#allocation7 + $0x70] sm:$0xff]  ;;  %s703_s18 = sshll.u32 %s1087_s22, 7  ;;  %s711_s26 = sshll.u32 %s1012_s16, 7 }
  0x32   : > { %275 = vmatpush.msra.mxu0 %v274_v0  ;;  %712 = vmatpush.msra.mxu3 %v274_v0  ;;  %v272_v2 = vld [vmem:[#allocation7 + $0x68] sm:$0xff]  ;;  %v271_v3 = vld [vmem:[#allocation7 + $0x60] sm:$0xff]  ;;  %v270_v4 = vld [vmem:[#allocation7 + $0x58] sm:$0xff]  ;;  %s1137_s23 = scalar_lea.vmem [#allocation8], %s703_s18  ;;  %s594_s29 = scalar_lea.hbm %s1192_s3, %s711_s26 }
  0x33   : > { %v269_v5 = vld [vmem:[#allocation7 + $0x50] sm:$0xff]  ;;  %v268_v6 = vld [vmem:[#allocation7 + $0x48] sm:$0xff]  ;;  %v267_v7 = vld [vmem:[#allocation7 + $0x40] sm:$0xff]  ;;  %s595_s4 = sshll.u32 %s1137_s23, 4  ;;  %s597_s5 = sshll.u32 %s594_s29, 4  ;;  %s596_s4 = int_to_ptr.vmem [resolvable:$true] %s595_s4  ;;  %s598_s5 = int_to_ptr.hbm [resolvable:$true] %s597_s5 }
  0x34   : > { %276 = vmatpush.msra.mxu0 %v273_v1  ;;  %713 = vmatpush.msra.mxu3 %v273_v1  ;;  %v266_v8 = vld [vmem:[#allocation7 + $0x38] sm:$0xff]  ;;  %v265_v9 = vld [vmem:[#allocation7 + $0x30] sm:$0xff]  ;;  %v264_v10 = vld [vmem:[#allocation7 + $0x28] sm:$0xff]  ;;  %s583_s7 = scalar_lea.sflag [#allocation4], %s1087_s22  ;;  %s905_s8 = sshra.s32 %s598_s5, 4  ;;  %s906_s8 = int_to_ptr.hbm [resolvable:$true] %s905_s8 }
  0x35   : > { %v263_v11 = vld [vmem:[#allocation7 + $0x20] sm:$0xff]  ;;  %v262_v12 = vld [vmem:[#allocation7 + $0x18] sm:$0xff]  ;;  %v261_v13 = vld [vmem:[#allocation7 + $0x10] sm:$0xff]  ;;  %s907_s16 = scalar_lea.hbm %s906_s8, 128  ;;  %s911_s11 = scalar_lea.hbm %s1192_s3, 256 }
  0x36   : > { %277 = vmatpush.msra.mxu0 %v272_v2  ;;  %714 = vmatpush.msra.mxu3 %v272_v2  ;;  %v260_v14 = vld [vmem:[#allocation7 + $0x8] sm:$0xff]  ;;  %v259_v15 = vld [vmem:[#allocation7] sm:$0xff]  ;;  %v229_v20 = vld [vmem:[#allocation5 + $0x10] sm:$0xff]  ;;  %p908_p1 = scmp.ne.s32.totalorder %s906_s8, %s907_s16  ;;  %p912_p11 = scmp.lt.s32.totalorder %s906_s8, %s1192_s3 }
  0x37   : > { %v227_v16 = vld [vmem:[#allocation5] sm:$0xff]  ;;  %v228_v18 = vld [vmem:[#allocation5 + $0x8] sm:$0xff]  ;;  %v245_v21 = vld [vmem:[#allocation5 + $0x90] sm:$0xff]  ;;  %p913_p2 = scmp.lt.s32.totalorder %s911_s11, %s907_s16 }
  0x38   : > { %278 = vmatpush.msra.mxu0 %v271_v3  ;;  %715 = vmatpush.msra.mxu3 %v271_v3  ;;  %v243_v17 = vld [vmem:[#allocation5 + $0x80] sm:$0xff]  ;;  %v244_v19 = vld [vmem:[#allocation5 + $0x88] sm:$0xff]  ;;  %v230_v22 = vld [vmem:[#allocation5 + $0x18] sm:$0xff]  ;;  %p909_p4 = pnand %p908_p1, %p1057_p3 }
  0x39   : > { %v246_v23 = vld [vmem:[#allocation5 + $0x98] sm:$0xff]  ;;  %v231_v24 = vld [vmem:[#allocation5 + $0x20] sm:$0xff]  ;;  %v232_v26 = vld [vmem:[#allocation5 + $0x28] sm:$0xff]  ;;  %p914_p9 = por %p913_p2, %p912_p11 }
  0x3a   : > { %279 = vmatpush.msra.mxu0 %v270_v4  ;;  %716 = vmatpush.msra.mxu3 %v270_v4  ;;  %v247_v25 = vld [vmem:[#allocation5 + $0xa0] sm:$0xff]  ;;  %v248_v27 = vld [vmem:[#allocation5 + $0xa8] sm:$0xff]  ;;  %v233_v28 = vld [vmem:[#allocation5 + $0x30] sm:$0xff]  ;;  %p910_p8 = pneg %p909_p4 }
  0x3b   : > { %v249_v29 = vld [vmem:[#allocation5 + $0xb0] sm:$0xff]  ;;  %v234_v30 = vld [vmem:[#allocation5 + $0x38] sm:$0xff]  ;;  %v235_v32 = vld [vmem:[#allocation5 + $0x40] sm:$0xff] }
  0x3c   : > { %280 = vmatpush.msra.mxu0 %v269_v5  ;;  %717 = vmatpush.msra.mxu3 %v269_v5  ;;  %v250_v31 = vld [vmem:[#allocation5 + $0xb8] sm:$0xff]  ;;  %v251_v33 = vld [vmem:[#allocation5 + $0xc0] sm:$0xff]  ;;  %v236_v34 = vld [vmem:[#allocation5 + $0x48] sm:$0xff]  ;;  %p915_p10 = pnand %p914_p9, %p910_p8 }
  0x3d   : > { %v252_v35 = vld [vmem:[#allocation5 + $0xc8] sm:$0xff]  ;;  %v237_v36 = vld [vmem:[#allocation5 + $0x50] sm:$0xff]  ;;  %v238_v38 = vld [vmem:[#allocation5 + $0x58] sm:$0xff] }
  0x3e   : > { %281 = vmatpush.msra.mxu0 %v268_v6  ;;  %718 = vmatpush.msra.mxu3 %v268_v6  ;;  %v253_v37 = vld [vmem:[#allocation5 + $0xd0] sm:$0xff]  ;;  %v254_v39 = vld [vmem:[#allocation5 + $0xd8] sm:$0xff]  ;;  %v239_v40 = vld [vmem:[#allocation5 + $0x60] sm:$0xff] }
  0x3f   : > { %v255_v41 = vld [vmem:[#allocation5 + $0xe0] sm:$0xff]  ;;  %v240_v42 = vld [vmem:[#allocation5 + $0x68] sm:$0xff]  ;;  %v241_v44 = vld [vmem:[#allocation5 + $0x70] sm:$0xff] }
  0x40   : > { %282 = vmatpush.msra.mxu0 %v267_v7  ;;  %719 = vmatpush.msra.mxu3 %v267_v7  ;;  %v256_v43 = vld [vmem:[#allocation5 + $0xe8] sm:$0xff]  ;;  %v257_v45 = vld [vmem:[#allocation5 + $0xf0] sm:$0xff]  ;;  %v242_v46 = vld [vmem:[#allocation5 + $0x78] sm:$0xff] }
  0x41   : > { %v258_v47 = vld [vmem:[#allocation5 + $0xf8] sm:$0xff] }
  0x42   : > { %283 = vmatpush.msra.mxu0 %v266_v8  ;;  %720 = vmatpush.msra.mxu3 %v266_v8 }
  0x44   : > { %284 = vmatpush.msra.mxu0 %v265_v9  ;;  %721 = vmatpush.msra.mxu3 %v265_v9 }
  0x46   : > { %285 = vmatpush.msra.mxu0 %v264_v10  ;;  %722 = vmatpush.msra.mxu3 %v264_v10 }
  0x48   : > { %286 = vmatpush.msra.mxu0 %v263_v11  ;;  %723 = vmatpush.msra.mxu3 %v263_v11 }
  0x4a   : > { %287 = vmatpush.msra.mxu0 %v262_v12  ;;  %724 = vmatpush.msra.mxu3 %v262_v12 }
  0x4c   : > { %288 = vmatpush.msra.mxu0 %v261_v13  ;;  %725 = vmatpush.msra.mxu3 %v261_v13 }
  0x4e   : > { %289 = vmatpush.msra.mxu0 %v260_v14  ;;  %726 = vmatpush.msra.mxu3 %v260_v14 }
  0x50   : > { %290 = vmatpush.msra.mxu0 %v259_v15  ;;  %727 = vmatpush.msra.mxu3 %v259_v15 }
  0x51   : > { %291 = vmatmul.f32.vlgmr.msra.gmra.mxu0 %v227_v16  ;;  %339 = vmatmul.f32.vlgmr.msra.gmra.mxu3 %v243_v17  ;;  %v388_v16 = vld [vmem:[%s1091_s30] sm:$0xff]  ;;  %v389_v17 = vld [vmem:[%s1091_s30 + $0x8] sm:$0xff] }
  0x59   : > { %294 = vmatmul.f32.gmra.mxu0 %v228_v18  ;;  %342 = vmatmul.f32.gmra.mxu3 %v244_v19  ;;  %v390_v18 = vld [vmem:[%s1091_s30 + $0x10] sm:$0xff]  ;;  %v391_v19 = vld [vmem:[%s1091_s30 + $0x18] sm:$0xff] }
  0x61   : > { %297 = vmatmul.f32.gmra.mxu0 %v229_v20  ;;  %345 = vmatmul.f32.gmra.mxu3 %v245_v21  ;;  %v392_v20 = vld [vmem:[%s1091_s30 + $0x20] sm:$0xff]  ;;  %v393_v21 = vld [vmem:[%s1091_s30 + $0x28] sm:$0xff] }
  0x69   : > { %300 = vmatmul.f32.gmra.mxu0 %v230_v22  ;;  %348 = vmatmul.f32.gmra.mxu3 %v246_v23  ;;  %v394_v22 = vld [vmem:[%s1091_s30 + $0x30] sm:$0xff]  ;;  %v395_v23 = vld [vmem:[%s1091_s30 + $0x38] sm:$0xff] }
  0x71   : > { %303 = vmatmul.f32.gmra.mxu0 %v231_v24  ;;  %351 = vmatmul.f32.gmra.mxu3 %v247_v25  ;;  %v396_v24 = vld [vmem:[%s1091_s30 + $0x40] sm:$0xff]  ;;  %v397_v25 = vld [vmem:[%s1091_s30 + $0x48] sm:$0xff] }
  0x79   : > { %306 = vmatmul.f32.gmra.mxu0 %v232_v26  ;;  %354 = vmatmul.f32.gmra.mxu3 %v248_v27  ;;  %v398_v26 = vld [vmem:[%s1091_s30 + $0x50] sm:$0xff]  ;;  %v399_v27 = vld [vmem:[%s1091_s30 + $0x58] sm:$0xff] }
  0x81   : > { %309 = vmatmul.f32.gmra.mxu0 %v233_v28  ;;  %357 = vmatmul.f32.gmra.mxu3 %v249_v29  ;;  %v400_v28 = vld [vmem:[%s1091_s30 + $0x60] sm:$0xff]  ;;  %v401_v29 = vld [vmem:[%s1091_s30 + $0x68] sm:$0xff] }
  0x89   : > { %312 = vmatmul.f32.gmra.mxu0 %v234_v30  ;;  %360 = vmatmul.f32.gmra.mxu3 %v250_v31  ;;  %v402_v30 = vld [vmem:[%s1091_s30 + $0x70] sm:$0xff]  ;;  %v403_v31 = vld [vmem:[%s1091_s30 + $0x78] sm:$0xff] }
  0x91   : > { %315 = vmatmul.f32.gmra.mxu0 %v235_v32  ;;  %363 = vmatmul.f32.gmra.mxu3 %v251_v33  ;;  %v404_v32 = vld [vmem:[%s1091_s30 + $0x80] sm:$0xff]  ;;  %v405_v33 = vld [vmem:[%s1091_s30 + $0x88] sm:$0xff] }
  0x99   : > { %318 = vmatmul.f32.gmra.mxu0 %v236_v34  ;;  %366 = vmatmul.f32.gmra.mxu3 %v252_v35  ;;  %v406_v34 = vld [vmem:[%s1091_s30 + $0x90] sm:$0xff]  ;;  %v407_v35 = vld [vmem:[%s1091_s30 + $0x98] sm:$0xff] }
  0xa1   : > { %321 = vmatmul.f32.gmra.mxu0 %v237_v36  ;;  %369 = vmatmul.f32.gmra.mxu3 %v253_v37  ;;  %v408_v36 = vld [vmem:[%s1091_s30 + $0xa0] sm:$0xff]  ;;  %v409_v37 = vld [vmem:[%s1091_s30 + $0xa8] sm:$0xff] }
  0xa9   : > { %324 = vmatmul.f32.gmra.mxu0 %v238_v38  ;;  %372 = vmatmul.f32.gmra.mxu3 %v254_v39  ;;  %v410_v38 = vld [vmem:[%s1091_s30 + $0xb0] sm:$0xff]  ;;  %v411_v39 = vld [vmem:[%s1091_s30 + $0xb8] sm:$0xff] }
  0xb1   : > { %327 = vmatmul.f32.gmra.mxu0 %v239_v40  ;;  %375 = vmatmul.f32.gmra.mxu3 %v255_v41  ;;  %v412_v40 = vld [vmem:[%s1091_s30 + $0xc0] sm:$0xff]  ;;  %v413_v41 = vld [vmem:[%s1091_s30 + $0xc8] sm:$0xff] }
  0xb9   : > { %330 = vmatmul.f32.gmra.mxu0 %v240_v42  ;;  %378 = vmatmul.f32.gmra.mxu3 %v256_v43  ;;  %v414_v42 = vld [vmem:[%s1091_s30 + $0xd0] sm:$0xff]  ;;  %v415_v43 = vld [vmem:[%s1091_s30 + $0xd8] sm:$0xff] }
  0xc1   : > { %333 = vmatmul.f32.gmra.mxu0 %v241_v44  ;;  %381 = vmatmul.f32.gmra.mxu3 %v257_v45  ;;  %v416_v44 = vld [vmem:[%s1091_s30 + $0xe0] sm:$0xff]  ;;  %v417_v45 = vld [vmem:[%s1091_s30 + $0xe8] sm:$0xff] }
  0xc9   : > { %336 = vmatmul.f32.gmra.mxu0 %v242_v46  ;;  %384 = vmatmul.f32.gmra.mxu3 %v258_v47  ;;  %v418_v46 = vld [vmem:[%s1091_s30 + $0xf0] sm:$0xff]  ;;  %v419_v47 = vld [vmem:[%s1091_s30 + $0xf8] sm:$0xff] }
  0xce   : > { %v292_v48 = vpop.f32.mrf.mxu0 }
  0xd4   : > { %v1101_v49 = vpop.f32.mrf.mxu3 }
  0xd6   : > { %v295_v50 = vpop.f32.mrf.mxu0 }
  0xdc   : > { %v343_v51 = vpop.f32.mrf.mxu3 }
  0xde   : > { %v298_v52 = vpop.f32.mrf.mxu0 }
  0xe4   : > { %v346_v53 = vpop.f32.mrf.mxu3 }
  0xe6   : > { %v301_v54 = vpop.f32.mrf.mxu0 }
  0xec   : > { %v349_v55 = vpop.f32.mrf.mxu3 }
  0xee   : > { %v304_v56 = vpop.f32.mrf.mxu0 }
  0xf4   : > { %v352_v57 = vpop.f32.mrf.mxu3 }
  0xf6   : > { %v307_v58 = vpop.f32.mrf.mxu0 }
  0xfc   : > { %v355_v59 = vpop.f32.mrf.mxu3 }
  0xfe   : > { %v310_v60 = vpop.f32.mrf.mxu0 }
 0x104   : > { %v358_v61 = vpop.f32.mrf.mxu3 }
 0x106   : > { %v313_v62 = vpop.f32.mrf.mxu0 }
 0x10c   : > { %v361_v63 = vpop.f32.mrf.mxu3 }
 0x10e   : > { %v316_v0 = vpop.f32.mrf.mxu0 }
 0x114   : > { %v364_v1 = vpop.f32.mrf.mxu3 }
 0x116   : > { %v319_v2 = vpop.f32.mrf.mxu0 }
 0x11c   : > { %v367_v3 = vpop.f32.mrf.mxu3 }
 0x11e   : > { %v322_v4 = vpop.f32.mrf.mxu0 }
 0x124   : > { %v370_v5 = vpop.f32.mrf.mxu3 }
 0x126   : > { %v325_v6 = vpop.f32.mrf.mxu0 }
 0x12c   : > { %v373_v7 = vpop.f32.mrf.mxu3 }
 0x12e   : > { %v328_v8 = vpop.f32.mrf.mxu0 }
 0x134   : > { %v376_v9 = vpop.f32.mrf.mxu3 }
 0x136   : > { %v331_v10 = vpop.f32.mrf.mxu0 }
 0x13c   : > { %v379_v11 = vpop.f32.mrf.mxu3 }
 0x13e   : > { %v334_v12 = vpop.f32.mrf.mxu0 }
 0x144   : > { %v382_v13 = vpop.f32.mrf.mxu3 }
 0x146   : > { %v337_v14 = vpop.f32.mrf.mxu0 }
 0x147   : > { %420 = vmatpush.msra.mxu1 %v337_v14 }
 0x149   : > { %421 = vmatpush.msra.mxu1 %v334_v12 }
 0x14b   : > { %422 = vmatpush.msra.mxu1 %v331_v10 }
 0x14c   : > { %v385_v15 = vpop.f32.mrf.mxu3 }
 0x14d   : > { %423 = vmatpush.msra.mxu1 %v328_v8  ;;  %485 = vmatpush.msra.mxu2 %v385_v15 }
 0x14f   : > { %424 = vmatpush.msra.mxu1 %v325_v6  ;;  %486 = vmatpush.msra.mxu2 %v382_v13 }
 0x151   : > { %425 = vmatpush.msra.mxu1 %v322_v4  ;;  %487 = vmatpush.msra.mxu2 %v379_v11 }
 0x153   : > { %426 = vmatpush.msra.mxu1 %v319_v2  ;;  %488 = vmatpush.msra.mxu2 %v376_v9 }
 0x155   : > { %427 = vmatpush.msra.mxu1 %v316_v0  ;;  %489 = vmatpush.msra.mxu2 %v373_v7 }
 0x157   : > { %428 = vmatpush.msra.mxu1 %v313_v62  ;;  %490 = vmatpush.msra.mxu2 %v370_v5 }
 0x159   : > { %429 = vmatpush.msra.mxu1 %v310_v60  ;;  %491 = vmatpush.msra.mxu2 %v367_v3 }
 0x15b   : > { %430 = vmatpush.msra.mxu1 %v307_v58  ;;  %492 = vmatpush.msra.mxu2 %v364_v1 }
 0x15d   : > { %431 = vmatpush.msra.mxu1 %v304_v56  ;;  %493 = vmatpush.msra.mxu2 %v361_v63 }
 0x15f   : > { %432 = vmatpush.msra.mxu1 %v301_v54  ;;  %494 = vmatpush.msra.mxu2 %v358_v61 }
 0x161   : > { %433 = vmatpush.msra.mxu1 %v298_v52  ;;  %495 = vmatpush.msra.mxu2 %v355_v59 }
 0x163   : > { %434 = vmatpush.msra.mxu1 %v295_v50  ;;  %496 = vmatpush.msra.mxu2 %v352_v57 }
 0x165   : > { %435 = vmatpush.msra.mxu1 %v292_v48  ;;  %497 = vmatpush.msra.mxu2 %v349_v55 }
 0x166   : > { %436 = vmatmul.f32.vlgmr.msra.gmra.mxu1 %v388_v16 }
 0x167   : > { %498 = vmatpush.msra.mxu2 %v346_v53 }
 0x169   : > { %499 = vmatpush.msra.mxu2 %v343_v51 }
 0x16b   : > { %500 = vmatpush.msra.mxu2 %v1101_v49 }
 0x16c   : > { %501 = vmatmul.f32.vlgmr.msra.gmra.mxu2 %v389_v17 }
 0x16e   : > { %439 = vmatmul.f32.gmra.mxu1 %v390_v18 }
 0x174   : > { %504 = vmatmul.f32.gmra.mxu2 %v391_v19 }
 0x176   : > { %442 = vmatmul.f32.gmra.mxu1 %v392_v20 }
 0x17c   : > { %507 = vmatmul.f32.gmra.mxu2 %v393_v21 }
 0x17e   : > { %445 = vmatmul.f32.gmra.mxu1 %v394_v22 }
 0x184   : > { %510 = vmatmul.f32.gmra.mxu2 %v395_v23 }
 0x186   : > { %448 = vmatmul.f32.gmra.mxu1 %v396_v24 }
 0x18c   : > { %513 = vmatmul.f32.gmra.mxu2 %v397_v25 }
 0x18e   : > { %451 = vmatmul.f32.gmra.mxu1 %v398_v26 }
 0x194   : > { %516 = vmatmul.f32.gmra.mxu2 %v399_v27 }
 0x196   : > { %454 = vmatmul.f32.gmra.mxu1 %v400_v28 }
 0x19c   : > { %519 = vmatmul.f32.gmra.mxu2 %v401_v29 }
 0x19e   : > { %457 = vmatmul.f32.gmra.mxu1 %v402_v30 }
 0x1a4   : > { %522 = vmatmul.f32.gmra.mxu2 %v403_v31 }
 0x1a6   : > { %460 = vmatmul.f32.gmra.mxu1 %v404_v32 }
 0x1ac   : > { %525 = vmatmul.f32.gmra.mxu2 %v405_v33 }
 0x1ae   : > { %463 = vmatmul.f32.gmra.mxu1 %v406_v34 }
 0x1b4   : > { %528 = vmatmul.f32.gmra.mxu2 %v407_v35 }
 0x1b6   : > { %466 = vmatmul.f32.gmra.mxu1 %v408_v36 }
 0x1bc   : > { %531 = vmatmul.f32.gmra.mxu2 %v409_v37 }
 0x1be   : > { %469 = vmatmul.f32.gmra.mxu1 %v410_v38 }
 0x1c4   : > { %534 = vmatmul.f32.gmra.mxu2 %v411_v39 }
 0x1c6   : > { %472 = vmatmul.f32.gmra.mxu1 %v412_v40 }
 0x1cc   : > { %537 = vmatmul.f32.gmra.mxu2 %v413_v41 }
 0x1ce   : > { %475 = vmatmul.f32.gmra.mxu1 %v414_v42 }
 0x1d4   : > { %540 = vmatmul.f32.gmra.mxu2 %v415_v43 }
 0x1d6   : > { %478 = vmatmul.f32.gmra.mxu1 %v416_v44 }
 0x1dc   : > { %543 = vmatmul.f32.gmra.mxu2 %v417_v45 }
 0x1de   : > { %481 = vmatmul.f32.gmra.mxu1 %v418_v46 }
 0x1e3   : > { %v437_v48 = vpop.f32.mrf.mxu1 }
 0x1e4   : > { %546 = vmatmul.f32.gmra.mxu2 %v419_v47 }
 0x1eb   : > { %v440_v49 = vpop.f32.mrf.mxu1 }
 0x1ef   : > { %v502_v50 = vpop.f32.mrf.mxu2 }
 0x1f0   : > { %v503_v51 = vadd.f32 %v502_v50, %v437_v48 }
 0x1f2   : > { %v550_v52 = vmax.f32 %v503_v51, 0.0 }
 0x1f3   : > { %v443_v53 = vpop.f32.mrf.mxu1 }
 0x1f4   : > { %566 = vst [vmem:[%s1137_s23] sm:$0xff] %v550_v52 }
 0x1f7   : > { %v505_v54 = vpop.f32.mrf.mxu2 }
 0x1f8   : > { %v506_v55 = vadd.f32 %v505_v54, %v440_v49 }
 0x1fa   : > { %v551_v56 = vmax.f32 %v506_v55, 0.0 }
 0x1fb   : > { %v446_v57 = vpop.f32.mrf.mxu1 }
 0x1fc   : > { %567 = vst [vmem:[%s1137_s23 + $0x8] sm:$0xff] %v551_v56 }
 0x1ff   : > { %v508_v58 = vpop.f32.mrf.mxu2 }
 0x200   : > { %v509_v59 = vadd.f32 %v508_v58, %v443_v53 }
 0x202   : > { %v552_v60 = vmax.f32 %v509_v59, 0.0 }
 0x203   : > { %v449_v61 = vpop.f32.mrf.mxu1 }
 0x204   : > { %568 = vst [vmem:[%s1137_s23 + $0x10] sm:$0xff] %v552_v60 }
 0x207   : > { %v511_v62 = vpop.f32.mrf.mxu2 }
 0x208   : > { %v512_v63 = vadd.f32 %v511_v62, %v446_v57 }
 0x20a   : > { %v553_v0 = vmax.f32 %v512_v63, 0.0 }
 0x20b   : > { %v452_v1 = vpop.f32.mrf.mxu1 }
 0x20c   : > { %569 = vst [vmem:[%s1137_s23 + $0x18] sm:$0xff] %v553_v0 }
 0x20f   : > { %v514_v2 = vpop.f32.mrf.mxu2 }
 0x210   : > { %v515_v3 = vadd.f32 %v514_v2, %v449_v61 }
 0x212   : > { %v554_v4 = vmax.f32 %v515_v3, 0.0 }
 0x213   : > { %v455_v5 = vpop.f32.mrf.mxu1 }
 0x214   : > { %570 = vst [vmem:[%s1137_s23 + $0x20] sm:$0xff] %v554_v4 }
 0x217   : > { %v517_v6 = vpop.f32.mrf.mxu2 }
 0x218   : > { %v518_v7 = vadd.f32 %v517_v6, %v452_v1 }
 0x21a   : > { %v555_v8 = vmax.f32 %v518_v7, 0.0 }
 0x21b   : > { %v458_v9 = vpop.f32.mrf.mxu1 }
 0x21c   : > { %571 = vst [vmem:[%s1137_s23 + $0x28] sm:$0xff] %v555_v8 }
 0x21f   : > { %v520_v10 = vpop.f32.mrf.mxu2 }
 0x220   : > { %v521_v11 = vadd.f32 %v520_v10, %v455_v5 }
 0x222   : > { %v556_v12 = vmax.f32 %v521_v11, 0.0 }
 0x223   : > { %v461_v13 = vpop.f32.mrf.mxu1 }
 0x224   : > { %572 = vst [vmem:[%s1137_s23 + $0x30] sm:$0xff] %v556_v12 }
 0x227   : > { %v523_v14 = vpop.f32.mrf.mxu2 }
 0x228   : > { %v524_v15 = vadd.f32 %v523_v14, %v458_v9 }
 0x22a   : > { %v557_v16 = vmax.f32 %v524_v15, 0.0 }
 0x22b   : > { %v464_v17 = vpop.f32.mrf.mxu1 }
 0x22c   : > { %573 = vst [vmem:[%s1137_s23 + $0x38] sm:$0xff] %v557_v16 }
 0x22f   : > { %v526_v18 = vpop.f32.mrf.mxu2 }
 0x230   : > { %v527_v19 = vadd.f32 %v526_v18, %v461_v13 }
 0x232   : > { %v558_v20 = vmax.f32 %v527_v19, 0.0 }
 0x233   : > { %v467_v21 = vpop.f32.mrf.mxu1 }
 0x234   : > { %574 = vst [vmem:[%s1137_s23 + $0x40] sm:$0xff] %v558_v20 }
 0x237   : > { %v529_v22 = vpop.f32.mrf.mxu2 }
 0x238   : > { %v530_v23 = vadd.f32 %v529_v22, %v464_v17 }
 0x23a   : > { %v559_v24 = vmax.f32 %v530_v23, 0.0 }
 0x23b   : > { %v470_v25 = vpop.f32.mrf.mxu1 }
 0x23c   : > { %575 = vst [vmem:[%s1137_s23 + $0x48] sm:$0xff] %v559_v24 }
 0x23f   : > { %v532_v26 = vpop.f32.mrf.mxu2 }
 0x240   : > { %v533_v27 = vadd.f32 %v532_v26, %v467_v21 }
 0x242   : > { %v560_v28 = vmax.f32 %v533_v27, 0.0 }
 0x243   : > { %v473_v30 = vpop.f32.mrf.mxu1 }
 0x244   : > { %576 = vst [vmem:[%s1137_s23 + $0x50] sm:$0xff] %v560_v28 }
 0x247   : > { %v535_v29 = vpop.f32.mrf.mxu2 }
 0x248   : > { %v536_v31 = vadd.f32 %v535_v29, %v470_v25 }
 0x24a   : > { %v561_v32 = vmax.f32 %v536_v31, 0.0 }
 0x24b   : > { %v476_v35 = vpop.f32.mrf.mxu1 }
 0x24c   : > { %577 = vst [vmem:[%s1137_s23 + $0x58] sm:$0xff] %v561_v32 }
 0x24f   : > { %v538_v33 = vpop.f32.mrf.mxu2 }
 0x250   : > { %v539_v34 = vadd.f32 %v538_v33, %v473_v30 }
 0x252   : > { %v562_v36 = vmax.f32 %v539_v34, 0.0 }
 0x253   : > { %v479_v40 = vpop.f32.mrf.mxu1 }
 0x254   : > { %578 = vst [vmem:[%s1137_s23 + $0x60] sm:$0xff] %v562_v36 }
 0x257   : > { %v541_v37 = vpop.f32.mrf.mxu2 }
 0x258   : > { %v542_v38 = vadd.f32 %v541_v37, %v476_v35 }
 0x25a   : > { %v563_v39 = vmax.f32 %v542_v38, 0.0 }
 0x25b   : > { %v482_v44 = vpop.f32.mrf.mxu1 }
 0x25c   : > { %579 = vst [vmem:[%s1137_s23 + $0x68] sm:$0xff] %v563_v39 }
 0x25f   : > { %v544_v41 = vpop.f32.mrf.mxu2 }
 0x260   : > { %v545_v42 = vadd.f32 %v544_v41, %v479_v40 }
 0x262   : > { %v564_v43 = vmax.f32 %v545_v42, 0.0 }
 0x264   : > { %580 = vst [vmem:[%s1137_s23 + $0x70] sm:$0xff] %v564_v43 }
 0x267   : > { %v547_v45 = vpop.f32.mrf.mxu2 }
 0x268   : > { %v548_v46 = vadd.f32 %v547_v45, %v482_v44 }
 0x26a   : > { %v565_v47 = vmax.f32 %v548_v46, 0.0 }
 0x26c   : > { %581 = vst [vmem:[%s1137_s23 + $0x78] sm:$0xff] %v565_v47 }
 0x26d   : > { %918 = shalt.err (!%p915_p10)
}
 0x26e   : > { %s969_s22 = smov 128   ;;  %s970_s25 = smov 8  }
 0x26f   : > { %738 = dma.vmem_to_hbm [thread:$0]  (%p1057_p3), %s596_s4, 2048, %s598_s5, %s583_s7, %s969_s22, %s969_s22, %s970_s25  }
 0x270 PF: > { %s612_s30 = sand.u32 1, %s949_s12   ;;  %p1198_p12 = scmp.ge.s32.totalorder %s961_s15, 2 }
 0x271   : > { %s613_s18 = scalar_lea.sflag [#allocation4], %s612_s30 }
 0x272   : > { %p752_p13 = pnand %p1198_p12, %p1026_p6 }
 0x274   : > { %p753_p0 = pneg %p752_p13 }
 0x276   : > { %944 = dma.done.wait (%p753_p0), %s613_s18, 2048  }
 0x277   : > { %946 = vsyncadd (%p753_p0), %s613_s18, 4294965248  ;;  %p17_p5 = scmp.ge.s32.totalorder %s1047_s6, 4   ;;  %s1199_s12 = smov %s953_s13 }
 0x278   : > { %s1200_s13 = smov %s957_s14  ;;  %s1201_s14 = smov %s1063_s10 }
 0x279   : > { %s1202_s15 = smov %s1047_s6  ;;  %19 = sbr.rel (!%p17_p5) target bundleno = 6 (0x6), region = 85 }
 0x27e   :  { %619 = vsyncpa [#allocation3], 1 }
 0x27f   :  { %621 = vsyncpa [#allocation3 + $0x1], 1 }
 0x280   :  { %622 = vsyncpa [#allocation6], 1 }
 0x281   :  { %623 = vsyncpa [#allocation4], 1 }
 0x282   :  { %625 = vsyncpa [#allocation4 + $0x1], 1 }

</bundles_post_ra>
